<compile_context>
chip_gen: v5e
topology: v5e:2x2
jax: 0.10.0
libtpu: 0.0.40
codegen_flags: <defaults>
</compile_context>

<pallas_src>
import functools

import numpy as np

import jax
import jax.numpy as jnp
from jax import lax
from jax.experimental import pallas as pl
from jax.experimental.pallas import tpu as pltpu

EPS = 1e-5
ACT_DTYPE = jnp.bfloat16          # activation / weight storage dtype
PALLAS_MIN_PIXELS = 256           # layers smaller than 16x16 go to plain XLA
PALLAS_MIN_COUT = 8               # cout<8 (side convs) go to plain XLA


# -----------------------------------------------------------------------------
# Hardware-aware knobs
# -----------------------------------------------------------------------------
@functools.lru_cache(maxsize=1)
def _vmem_limit_bytes():
    """Generation-aware scoped-VMEM limit (review: 48 MiB v7x, ~96 MiB v5e/v6e)."""
    cap = 64 * 1024 * 1024        # conservative default (v7x-sized)
    try:
        get_info = getattr(pltpu, "get_tpu_info", None)
        if get_info is not None:
            info = get_info()
            for attr in ("vmem_capacity_bytes", "vmem_size_bytes", "vmem_bytes"):
                v = getattr(info, attr, None)
                if v:
                    cap = int(v)
                    break
    except Exception:
        pass
    return max(32 * 1024 * 1024, min(100 * 1024 * 1024, (cap * 3) // 4))


@functools.lru_cache(maxsize=1)
def _mxu_k_width():
    try:
        kind = jax.devices()[0].device_kind.lower()
    except Exception:
        kind = ""
    if "v5e" in kind or "v5 lite" in kind or "v5lite" in kind:
        return 128
    return 256


def _num_tap_groups(cin_total):
    # Stack all 9 taps when that keeps K near the MXU width; else stack per-ky.
    return 1 if 9 * cin_total <= int(1.25 * _mxu_k_width()) else 3


def _select_rows(H, W, cin_total, cout, d, has_res, num_groups, budget):
    """Largest row-chunk whose VMEM working set fits the budget."""
    tpg = 9 // num_groups
    dW = d * W

    def est(tr):
        hwc = tr * W
        b = 2 * 2 * cin_total * hwc                    # double-buffered inputs
        b += 2 * 2 * cin_total * 2 * dW                # halo strips
        b += 2 * 2 * cout * hwc                        # output blocks
        if has_res:
            b += 2 * 2 * cout * hwc                    # residual blocks
        b += 2 * num_groups * cout * tpg * cin_total   # resident weights
        b += 2 * cin_total * (hwc + 2 * dW + 2 * d)    # halo'd-buffer scratch
        b += 2 * tpg * cin_total * hwc                 # stacked-tap scratch
        b += 4 * cout * hwc                            # f32 accumulator scratch
        return b

    cands = [H]
    for t in (1024, 512, 256, 128, 64, 32, 16, 8):
        if t < H and H % t == 0 and (t * W) % 128 == 0:
            cands.append(t)
    for tr in cands:
        if est(tr) <= budget:
            return tr
    return None


# -----------------------------------------------------------------------------
# Pallas kernel: fused (multi-input) 3x3 dilated conv + BN(eval) + ReLU (+ res)
# -----------------------------------------------------------------------------
def _conv3x3_kernel(*refs, cins, cout, W, rows, d, num_groups, relu, has_res):
    # refs:
    #   x parts  : k refs, (1, cin_i, rows*W) bf16  (channel-concat fused)
    #   halo     : (1, 1, cin_total, 2*d*W)  bf16   (top+bottom halo rows)
    #   weights  : (num_groups, cout, Kg)    bf16   (tap-stacked MXU LHS)
    #   scale    : (cout, 1) f32, bias: (cout, 1) f32
    #   [res]    : (1, cout, rows*W) bf16
    #   out      : (1, cout, rows*W)
    #   scratch  : hb (C, Lp) bf16, rhs (Kg, rows*W) bf16, acc (cout, rows*W) f32
    k = len(cins)
    x_refs = refs[:k]
    halo_ref = refs[k]
    w_ref = refs[k + 1]
    scale_ref = refs[k + 2]
    bias_ref = refs[k + 3]
    pos = k + 4
    res_ref = None
    if has_res:
        res_ref = refs[pos]
        pos += 1
    o_ref = refs[pos]
    hb_ref, rhs_ref, acc_ref = refs[pos + 1], refs[pos + 2], refs[pos + 3]

    C = sum(cins)
    HWc = rows * W
    dW = d * W

    # ---- assemble halo'd flat buffer: [0_d | top dW | main HWc | bottom dW | 0_d]
    zcap = jnp.zeros((C, d), hb_ref.dtype)
    hb_ref[:, 0:d] = zcap
    hb_ref[:, d + dW + HWc + dW:] = zcap
    halo = halo_ref[0, 0]
    hb_ref[:, d:d + dW] = halo[:, :dW]
    hb_ref[:, d + dW + HWc:d + dW + HWc + dW] = halo[:, dW:]
    off = 0
    for i in range(k):
        ci = cins[i]
        hb_ref[off:off + ci, d + dW:d + dW + HWc] = x_refs[i][0]
        off += ci

    # ---- per-kx column validity masks, generated in-kernel (no HBM mask DMA)
    col = jax.lax.broadcasted_iota(jnp.int32, (1, HWc), 1) % W
    mask_l = col >= d            # tap reads x - d
    mask_r = col < (W - d)       # tap reads x + d
    zero = jnp.array(0, dtype=hb_ref.dtype)

    if num_groups == 1:
        tap_groups = [[(ky, kx) for ky in range(3) for kx in range(3)]]
    else:
        tap_groups = [[(ky, kx) for kx in range(3)] for ky in range(3)]

    for g, taps in enumerate(tap_groups):
        for t, (ky, kx) in enumerate(taps):
            start = ky * dW + kx * d
            tap = hb_ref[:, start:start + HWc]
            if kx == 0:
                tap = jnp.where(mask_l, tap, zero)
            elif kx == 2:
                tap = jnp.where(mask_r, tap, zero)
            rhs_ref[t * C:(t + 1) * C, :] = tap
        part = jnp.dot(w_ref[g], rhs_ref[...],
                       preferred_element_type=jnp.float32)
        if g == 0:
            acc_ref[...] = part
        else:
            acc_ref[...] += part

    out = acc_ref[...] * scale_ref[...] + bias_ref[...]
    if relu:
        out = jnp.maximum(out, 0.0)
    if has_res:
        out = out + res_ref[0].astype(jnp.float32)
    o_ref[0] = out.astype(o_ref.dtype)


def _halo_strips(xs, d, rows, num_chunks):
    """(N, num_chunks, cin_total, 2*d*W): d rows above / below every row chunk
    (zeros at the image border)."""
    N, _, H, W = xs[0].shape
    idx_top = np.arange(num_chunks)[:, None] * rows + np.arange(d)[None, :]
    idx_bot = idx_top + rows + d
    idx = np.concatenate([idx_top, idx_bot], axis=1).reshape(-1)
    idx = jnp.asarray(idx, dtype=jnp.int32)
    parts = []
    for x in xs:
        xp = jnp.pad(x.astype(ACT_DTYPE), ((0, 0), (0, 0), (d, d), (0, 0)))
        s = jnp.take(xp, idx, axis=2)                        # (N, ci, R*2d, W)
        parts.append(s.reshape(N, x.shape[1], num_chunks, 2 * d, W))
    h = parts[0] if len(parts) == 1 else jnp.concatenate(parts, axis=1)
    h = jnp.transpose(h, (0, 2, 1, 3, 4))                    # (N, R, C, 2d, W)
    return h.reshape(N, num_chunks, -1, 2 * d * W)


def _conv3x3_pallas(xs, w, scale, bias, d, relu, out_dtype, residual, rows=None):
    N, _, H, W = xs[0].shape
    cins = tuple(int(x.shape[1]) for x in xs)
    cin_total = sum(cins)
    cout = int(w.shape[-1])
    has_res = residual is not None

    num_groups = _num_tap_groups(cin_total)
    tpg = 9 // num_groups
    Kg = tpg * cin_total

    vmem_limit = _vmem_limit_bytes()
    if rows is None:
        rows = _select_rows(H, W, cin_total, cout, d, has_res, num_groups,
                            budget=int(0.65 * vmem_limit))
        if rows is None:
            return None
    else:
        assert H % rows == 0
        assert rows == H or (rows % 8 == 0 and (rows * W) % 128 == 0)
    num_chunks = H // rows
    HWc = rows * W
    dW = d * W

    # ---- tap-stacked weights: (num_groups, cout, Kg) bf16 (MXU LHS)
    w9 = w.reshape(9, cin_total, cout)
    if num_groups == 1:
        groups_t = [list(range(9))]
    else:
        groups_t = [[ky * 3 + kx for kx in range(3)] for ky in range(3)]
    lhs = []
    for g in groups_t:
        wg = jnp.concatenate([w9[t] for t in g], axis=0)     # (Kg, cout)
        lhs.append(jnp.transpose(wg))                        # (cout, Kg)
    lhs = jnp.stack(lhs, axis=0).astype(ACT_DTYPE)

    x_parts = [x.reshape(N, ci, H * W).astype(ACT_DTYPE)
               for x, ci in zip(xs, cins)]
    halo = _halo_strips(xs, d, rows, num_chunks)
    scale2 = scale.reshape(cout, 1).astype(jnp.float32)
    bias2 = bias.reshape(cout, 1).astype(jnp.float32)

    operands = [*x_parts, halo, lhs, scale2, bias2]
    in_specs = (
        [pl.BlockSpec((1, ci, HWc), lambda n, r: (n, 0, r)) for ci in cins]
        + [pl.BlockSpec((1, 1, cin_total, 2 * dW), lambda n, r: (n, r, 0, 0)),
           pl.BlockSpec((num_groups, cout, Kg), lambda n, r: (0, 0, 0)),
           pl.BlockSpec((cout, 1), lambda n, r: (0, 0)),
           pl.BlockSpec((cout, 1), lambda n, r: (0, 0))])
    if has_res:
        operands.append(residual.reshape(N, cout, H * W).astype(ACT_DTYPE))
        in_specs.append(pl.BlockSpec((1, cout, HWc), lambda n, r: (n, 0, r)))

    Lp = HWc + 2 * dW + 2 * d
    kern = functools.partial(
        _conv3x3_kernel, cins=cins, cout=cout, W=W, rows=rows, d=d,
        num_groups=num_groups, relu=relu, has_res=has_res)

    out = pl.pallas_call(
        kern,
        out_shape=jax.ShapeDtypeStruct((N, cout, H * W), out_dtype),
        grid=(N, num_chunks),
        in_specs=in_specs,
        out_specs=pl.BlockSpec((1, cout, HWc), lambda n, r: (n, 0, r)),
        scratch_shapes=[pltpu.VMEM((cin_total, Lp), ACT_DTYPE),
                        pltpu.VMEM((Kg, HWc), ACT_DTYPE),
                        pltpu.VMEM((cout, HWc), jnp.float32)],
        compiler_params=pltpu.CompilerParams(
            dimension_semantics=("parallel", "parallel"),
            vmem_limit_bytes=vmem_limit),
    )(*operands)
    return out.reshape(N, cout, H, W)


def _conv3x3_xla(xs, w, scale, bias, dirate, stride, relu, out_dtype, residual):
    """Fallback: tiny spatial layers, cout<8 side convs, stride-2 stem conv."""
    x = xs[0] if len(xs) == 1 else jnp.concatenate(xs, axis=1)
    y = jax.lax.conv_general_dilated(
        x.astype(jnp.float32), w.astype(jnp.float32),
        window_strides=(stride, stride),
        padding=((dirate, dirate), (dirate, dirate)),
        rhs_dilation=(dirate, dirate),
        dimension_numbers=("NCHW", "HWIO", "NCHW"),
        preferred_element_type=jnp.float32)
    y = y * scale[None, :, None, None] + bias[None, :, None, None]
    if relu:
        y = jnp.maximum(y, 0.0)
    if residual is not None:
        y = y + residual.astype(jnp.float32)
    return y.astype(out_dtype)


def fused_conv3x3(xs, w, scale, bias, *, dirate=1, stride=1, relu=True,
                  out_dtype=ACT_DTYPE, residual=None, rows_per_chunk=None):
    """conv3x3(concat(xs, ch)) * scale + bias [+relu] [+residual], NCHW in/out."""
    _, _, H, W = xs[0].shape
    cout = int(w.shape[-1])
    if stride == 1 and H * W >= PALLAS_MIN_PIXELS and cout >= PALLAS_MIN_COUT:
        out = _conv3x3_pallas(xs, w, scale, bias, dirate, relu, out_dtype,
                              residual, rows=rows_per_chunk)
        if out is not None:
            return out
    return _conv3x3_xla(xs, w, scale, bias, dirate, stride, relu, out_dtype,
                        residual)


def rebn(p, xs, dirate=1, residual=None):
    """REBNCONV applied to the (fused) channel-concat of xs."""
    return fused_conv3x3(xs, p["w"], p["scale"], p["bias"],
                         dirate=dirate, stride=1, relu=True, residual=residual)


# -----------------------------------------------------------------------------
# Glue ops (plain XLA, NCHW)
# -----------------------------------------------------------------------------
def maxpool2x2_ceil(x):
    """nn.MaxPool2d(2, stride=2, ceil_mode=True)."""
    N, C, H, W = x.shape
    Hp = -(-H // 2) * 2
    Wp = -(-W // 2) * 2
    if Hp != H or Wp != W:
        x = jnp.pad(x, ((0, 0), (0, 0), (0, Hp - H), (0, Wp - W)),
                    constant_values=-jnp.inf)
    x = x.reshape(N, C, Hp // 2, 2, Wp // 2, 2)
    return jnp.max(x, axis=(3, 5))


def _shift_clamp(x, axis, direction):
    n = x.shape[axis]
    if direction < 0:
        body = lax.slice_in_dim(x, 0, n - 1, axis=axis)
        edge = lax.slice_in_dim(x, 0, 1, axis=axis)
        return jnp.concatenate([edge, body], axis=axis)
    body = lax.slice_in_dim(x, 1, n, axis=axis)
    edge = lax.slice_in_dim(x, n - 1, n, axis=axis)
    return jnp.concatenate([body, edge], axis=axis)


def _upsample2x_axis(x, axis):
    """Exact-2x bilinear (align_corners=False) along one spatial axis."""
    lo = _shift_clamp(x, axis, -1)
    hi = _shift_clamp(x, axis, +1)
    even = 0.75 * x + 0.25 * lo
    odd = 0.75 * x + 0.25 * hi
    y = jnp.stack([even, odd], axis=axis + 1)
    shape = list(x.shape)
    shape[axis] = shape[axis] * 2
    return y.reshape(shape)


def bilinear_resize_nchw(x, out_h, out_w):
    """General F.interpolate(mode='bilinear', align_corners=False)."""
    N, C, H, W = x.shape
    if H == out_h and W == out_w:
        return x
    ys = (jnp.arange(out_h, dtype=jnp.float32) + 0.5) * (H / out_h) - 0.5
    xs = (jnp.arange(out_w, dtype=jnp.float32) + 0.5) * (W / out_w) - 0.5
    ys = jnp.clip(ys, 0.0, H - 1)
    xs = jnp.clip(xs, 0.0, W - 1)
    y0 = jnp.floor(ys).astype(jnp.int32)
    x0 = jnp.floor(xs).astype(jnp.int32)
    y1 = jnp.minimum(y0 + 1, H - 1)
    x1 = jnp.minimum(x0 + 1, W - 1)
    wy = (ys - y0)[None, None, :, None]
    wx = (xs - x0)[None, None, None, :]
    xf = x.astype(jnp.float32)

    def gather(yi, xi):
        return jnp.take(jnp.take(xf, yi, axis=2), xi, axis=3)

    out = (gather(y0, x0) * (1 - wy) * (1 - wx)
           + gather(y0, x1) * (1 - wy) * wx
           + gather(y1, x0) * wy * (1 - wx)
           + gather(y1, x1) * wy * wx)
    return out.astype(x.dtype)


def upsample_like(src, tar):
    sh, sw = src.shape[2], src.shape[3]
    th, tw = tar.shape[2], tar.shape[3]
    if (sh, sw) == (th, tw):
        return src
    if th == 2 * sh and tw == 2 * sw:
        return _upsample2x_axis(_upsample2x_axis(src, 2), 3)
    return bilinear_resize_nchw(src, th, tw)


# -----------------------------------------------------------------------------
# Parameters (deterministic, synthetic; eval-mode BN folded into scale/bias)
# -----------------------------------------------------------------------------
def make_rebnconv_params(key, in_ch, out_ch):
    kw, kb, kg, kbe, km, kv = jax.random.split(key, 6)
    std = (2.0 / (9 * in_ch)) ** 0.5
    w = std * jax.random.normal(kw, (3, 3, in_ch, out_ch), jnp.float32)
    conv_b = 0.1 * jax.random.normal(kb, (out_ch,), jnp.float32)
    gamma = 1.0 + 0.1 * jax.random.normal(kg, (out_ch,), jnp.float32)
    beta = 0.1 * jax.random.normal(kbe, (out_ch,), jnp.float32)
    mean = 0.1 * jax.random.normal(km, (out_ch,), jnp.float32)
    var = jax.random.uniform(kv, (out_ch,), jnp.float32, 0.5, 1.5)
    scale = gamma / jnp.sqrt(var + EPS)
    bias = beta - mean * scale + conv_b * scale
    return {"w": w, "scale": scale, "bias": bias}


def make_plain_conv_params(key, in_ch, out_ch):
    kw, kb = jax.random.split(key)
    std = (2.0 / (9 * in_ch)) ** 0.5
    w = std * jax.random.normal(kw, (3, 3, in_ch, out_ch), jnp.float32)
    b = 0.1 * jax.random.normal(kb, (out_ch,), jnp.float32)
    return {"w": w, "scale": jnp.ones((out_ch,), jnp.float32), "bias": b}


def make_rsu_params(key, height, in_ch, mid_ch, out_ch):
    specs = [("in", in_ch, out_ch), ("1", out_ch, mid_ch)]
    specs += [(str(i), mid_ch, mid_ch) for i in range(2, height + 1)]
    specs += [(f"{i}d", 2 * mid_ch, mid_ch) for i in range(height - 1, 1, -1)]
    specs += [("1d", 2 * mid_ch, out_ch)]
    keys = jax.random.split(key, len(specs))
    return {n: make_rebnconv_params(k, ci, co)
            for k, (n, ci, co) in zip(keys, specs)}


def make_isnet_params(key, in_ch=3, out_ch=1, base=8):
    """base=64 -> original ISNetDIS widths; base=8 -> /8-scaled test model."""
    def ch(n):
        return max(1, (n * base) // 64)

    ks = jax.random.split(key, 18)
    p = {}
    p["conv_in"] = make_plain_conv_params(ks[0], in_ch, ch(64))
    p["stage1"] = make_rsu_params(ks[1], 7, ch(64), ch(32), ch(64))
    p["stage2"] = make_rsu_params(ks[2], 6, ch(64), ch(32), ch(128))
    p["stage3"] = make_rsu_params(ks[3], 5, ch(128), ch(64), ch(256))
    p["stage4"] = make_rsu_params(ks[4], 4, ch(256), ch(128), ch(512))
    p["stage5"] = make_rsu_params(ks[5], 4, ch(512), ch(256), ch(512))
    p["stage6"] = make_rsu_params(ks[6], 4, ch(512), ch(256), ch(512))
    p["stage5d"] = make_rsu_params(ks[7], 4, ch(1024), ch(256), ch(512))
    p["stage4d"] = make_rsu_params(ks[8], 4, ch(1024), ch(128), ch(256))
    p["stage3d"] = make_rsu_params(ks[9], 5, ch(512), ch(64), ch(128))
    p["stage2d"] = make_rsu_params(ks[10], 6, ch(256), ch(32), ch(64))
    p["stage1d"] = make_rsu_params(ks[11], 7, ch(128), ch(16), ch(64))
    p["side1"] = make_plain_conv_params(ks[12], ch(64), out_ch)
    p["side2"] = make_plain_conv_params(ks[13], ch(64), out_ch)
    p["side3"] = make_plain_conv_params(ks[14], ch(128), out_ch)
    p["side4"] = make_plain_conv_params(ks[15], ch(256), out_ch)
    p["side5"] = make_plain_conv_params(ks[16], ch(512), out_ch)
    p["side6"] = make_plain_conv_params(ks[17], ch(512), out_ch)
    return p


# -----------------------------------------------------------------------------
# RSU blocks (channel-concats and residual add fused into the conv kernels)
# -----------------------------------------------------------------------------
def rsu7(p, xs):
    hxin = rebn(p["in"], xs, 1)
    hx1 = rebn(p["1"], [hxin], 1)
    hx2 = rebn(p["2"], [maxpool2x2_ceil(hx1)], 1)
    hx3 = rebn(p["3"], [maxpool2x2_ceil(hx2)], 1)
    hx4 = rebn(p["4"], [maxpool2x2_ceil(hx3)], 1)
    hx5 = rebn(p["5"], [maxpool2x2_ceil(hx4)], 1)
    hx6 = rebn(p["6"], [maxpool2x2_ceil(hx5)], 1)
    hx7 = rebn(p["7"], [hx6], 2)
    hx6d = rebn(p["6d"], [hx7, hx6], 1)
    hx5d = rebn(p["5d"], [upsample_like(hx6d, hx5), hx5], 1)
    hx4d = rebn(p["4d"], [upsample_like(hx5d, hx4), hx4], 1)
    hx3d = rebn(p["3d"], [upsample_like(hx4d, hx3), hx3], 1)
    hx2d = rebn(p["2d"], [upsample_like(hx3d, hx2), hx2], 1)
    return rebn(p["1d"], [upsample_like(hx2d, hx1), hx1], 1, residual=hxin)


def rsu6(p, xs):
    hxin = rebn(p["in"], xs, 1)
    hx1 = rebn(p["1"], [hxin], 1)
    hx2 = rebn(p["2"], [maxpool2x2_ceil(hx1)], 1)
    hx3 = rebn(p["3"], [maxpool2x2_ceil(hx2)], 1)
    hx4 = rebn(p["4"], [maxpool2x2_ceil(hx3)], 1)
    hx5 = rebn(p["5"], [maxpool2x2_ceil(hx4)], 1)
    hx6 = rebn(p["6"], [hx5], 2)
    hx5d = rebn(p["5d"], [hx6, hx5], 1)
    hx4d = rebn(p["4d"], [upsample_like(hx5d, hx4), hx4], 1)
    hx3d = rebn(p["3d"], [upsample_like(hx4d, hx3), hx3], 1)
    hx2d = rebn(p["2d"], [upsample_like(hx3d, hx2), hx2], 1)
    return rebn(p["1d"], [upsample_like(hx2d, hx1), hx1], 1, residual=hxin)


def rsu5(p, xs):
    hxin = rebn(p["in"], xs, 1)
    hx1 = rebn(p["1"], [hxin], 1)
    hx2 = rebn(p["2"], [maxpool2x2_ceil(hx1)], 1)
    hx3 = rebn(p["3"], [maxpool2x2_ceil(hx2)], 1)
    hx4 = rebn(p["4"], [maxpool2x2_ceil(hx3)], 1)
    hx5 = rebn(p["5"], [hx4], 2)
    hx4d = rebn(p["4d"], [hx5, hx4], 1)
    hx3d = rebn(p["3d"], [upsample_like(hx4d, hx3), hx3], 1)
    hx2d = rebn(p["2d"], [upsample_like(hx3d, hx2), hx2], 1)
    return rebn(p["1d"], [upsample_like(hx2d, hx1), hx1], 1, residual=hxin)


def rsu4(p, xs):
    hxin = rebn(p["in"], xs, 1)
    hx1 = rebn(p["1"], [hxin], 1)
    hx2 = rebn(p["2"], [maxpool2x2_ceil(hx1)], 1)
    hx3 = rebn(p["3"], [maxpool2x2_ceil(hx2)], 1)
    hx4 = rebn(p["4"], [hx3], 2)
    hx3d = rebn(p["3d"], [hx4, hx3], 1)
    hx2d = rebn(p["2d"], [upsample_like(hx3d, hx2), hx2], 1)
    return rebn(p["1d"], [upsample_like(hx2d, hx1), hx1], 1, residual=hxin)


def rsu4f(p, xs):
    hxin = rebn(p["in"], xs, 1)
    hx1 = rebn(p["1"], [hxin], 1)
    hx2 = rebn(p["2"], [hx1], 2)
    hx3 = rebn(p["3"], [hx2], 4)
    hx4 = rebn(p["4"], [hx3], 8)
    hx3d = rebn(p["3d"], [hx4, hx3], 4)
    hx2d = rebn(p["2d"], [hx3d, hx2], 2)
    return rebn(p["1d"], [hx2d, hx1], 1, residual=hxin)


# -----------------------------------------------------------------------------
# ISNetDIS forward
# -----------------------------------------------------------------------------
def isnet_forward(params, x_nchw):
    x = x_nchw.astype(ACT_DTYPE)

    cin = params["conv_in"]
    hxin = fused_conv3x3([x], cin["w"], cin["scale"], cin["bias"],
                         dirate=1, stride=2, relu=False)

    hx1 = rsu7(params["stage1"], [hxin])
    hx2 = rsu6(params["stage2"], [maxpool2x2_ceil(hx1)])
    hx3 = rsu5(params["stage3"], [maxpool2x2_ceil(hx2)])
    hx4 = rsu4(params["stage4"], [maxpool2x2_ceil(hx3)])
    hx5 = rsu4f(params["stage5"], [maxpool2x2_ceil(hx4)])
    hx6 = rsu4f(params["stage6"], [maxpool2x2_ceil(hx5)])

    hx5d = rsu4f(params["stage5d"], [upsample_like(hx6, hx5), hx5])
    hx4d = rsu4(params["stage4d"], [upsample_like(hx5d, hx4), hx4])
    hx3d = rsu5(params["stage3d"], [upsample_like(hx4d, hx3), hx3])
    hx2d = rsu6(params["stage2d"], [upsample_like(hx3d, hx2), hx2])
    hx1d = rsu7(params["stage1d"], [upsample_like(hx2d, hx1), hx1])

    def side(name, h):
        sp = params[name]
        d = fused_conv3x3([h], sp["w"], sp["scale"], sp["bias"],
                          dirate=1, stride=1, relu=False,
                          out_dtype=jnp.float32)     # cout=1 -> routed to XLA
        d = bilinear_resize_nchw(d, x.shape[2], x.shape[3]) \
            if d.shape[2] * 2 != x.shape[2] else upsample_like(d, x)
        d = d.astype(jnp.float32)
        return jax.nn.sigmoid(d)

    d1 = side("side1", hx1d)
    d2 = side("side2", hx2d)
    d3 = side("side3", hx3d)
    d4 = side("side4", hx4d)
    d5 = side("side5", hx5d)
    d6 = side("side6", hx6)

    return [d1, d2, d3, d4, d5, d6], [hx1d, hx2d, hx3d, hx4d, hx5d, hx6]


# -----------------------------------------------------------------------------
# Main: kernel self-checks (vs XLA reference) + scaled-down ISNetDIS forward
# -----------------------------------------------------------------------------
if __name__ == "__main__":
    root = jax.random.PRNGKey(0)

    # --- direct conv-kernel checks: chunking, dilation, concat fusion, residual
    def _check(ck, parts, cout, H, W, d, use_res, rows):
        ks = jax.random.split(ck, len(parts) + 3)
        xs = [jax.random.normal(ks[i], (2, ci, H, W), jnp.float32)
              .astype(jnp.bfloat16).astype(jnp.float32)
              for i, ci in enumerate(parts)]
        cin = sum(parts)
        w = (0.2 * jax.random.normal(ks[-3], (3, 3, cin, cout), jnp.float32)
             ).astype(jnp.bfloat16).astype(jnp.float32)
        scale = jnp.ones((cout,), jnp.float32)
        bias = jnp.zeros((cout,), jnp.float32)
        residual = None
        if use_res:
            residual = (jax.random.normal(ks[-2], (2, cout, H, W), jnp.float32)
                        .astype(jnp.bfloat16).astype(jnp.float32))
        got = _conv3x3_pallas(xs, w, scale, bias, d, True, jnp.float32,
                              residual, rows=rows)
        want = _conv3x3_xla(xs, w, scale, bias, d, 1, True, jnp.float32,
                            residual)
        np.testing.assert_allclose(np.asarray(got), np.asarray(want),
                                   rtol=3e-2, atol=3e-2)

    k1, k2, k3, kx_, kp_ = jax.random.split(root, 5)
    _check(k1, (8,), 16, 16, 16, 1, False, None)      # single chunk, 9-tap stack
    _check(k2, (8, 8), 16, 32, 32, 2, True, 8)        # 4 row chunks, d=2, residual
    _check(k3, (48,), 16, 16, 32, 4, False, 8)        # per-ky stacking, d=4, chunks

    # --- scaled-down ISNetDIS (real architecture, widths /8, 64x64 input)
    N, IN_CH, OUT_CH, H, W = 2, 3, 1, 64, 64
    x = jax.random.normal(kx_, (N, IN_CH, H, W), jnp.float32)   # NCHW like PyTorch
    params = make_isnet_params(kp_, in_ch=IN_CH, out_ch=OUT_CH, base=8)

    fwd = jax.jit(isnet_forward)
    preds, feats = fwd(params, x)
    jax.block_until_ready((preds, feats))

    assert len(preds) == 6 and len(feats) == 6
    for dpred in preds:
        assert dpred.shape == (N, OUT_CH, H, W), dpred.shape
        df = dpred.astype(jnp.float32)
        assert bool(jnp.all(jnp.isfinite(df)))
        assert bool(jnp.all((df >= 0.0) & (df <= 1.0)))
    for f in feats:
        assert bool(jnp.all(jnp.isfinite(f.astype(jnp.float32))))
    print("KERNEL_OK")
</pallas_src>

<mosaic_0001>
module attributes {stable_mosaic.version = 11 : i64} {
  func.func @_conv3x3_kernel(%arg0: i32, %arg1: i32, %arg2: memref<1x8x256xbf16, #tpu.memory_space<vmem>>, %arg3: memref<1x1x8x32xbf16, #tpu.memory_space<vmem>>, %arg4: memref<1x16x72xbf16, #tpu.memory_space<vmem>>, %arg5: memref<16x1xf32, #tpu.memory_space<vmem>>, %arg6: memref<16x1xf32, #tpu.memory_space<vmem>>, %arg7: memref<1x16x256xf32, #tpu.memory_space<vmem>>, %arg8: memref<8x290xbf16, #tpu.memory_space<vmem>>, %arg9: memref<72x256xbf16, #tpu.memory_space<vmem>>, %arg10: memref<16x256xf32, #tpu.memory_space<vmem>>) attributes {dimension_semantics = [#tpu.dimension_semantics<parallel>, #tpu.dimension_semantics<parallel>], iteration_bounds = array<i64: 2, 1>, scalar_prefetch = 0 : i64, scratch_operands = 3 : i64, tpu.core_type = #tpu.core_type<tc>, window_params = [{transform_indices = @transform_0, window_bounds = array<i64: 1, 8, 256>}, {transform_indices = @transform_1, window_bounds = array<i64: 1, 1, 8, 32>}, {pipeline_mode = #tpu.pipeline_mode<synchronous>, transform_indices = @transform_2, window_bounds = array<i64: 1, 16, 72>}, {pipeline_mode = #tpu.pipeline_mode<synchronous>, transform_indices = @transform_3, window_bounds = array<i64: 16, 1>}, {pipeline_mode = #tpu.pipeline_mode<synchronous>, transform_indices = @transform_4, window_bounds = array<i64: 16, 1>}, {transform_indices = @transform_5, window_bounds = array<i64: 1, 16, 256>}]} {
    %cst = arith.constant 0.000000e+00 : bf16
    %0 = vector.broadcast %cst : bf16 to vector<8x1xbf16>
    %c0 = arith.constant 0 : index
    %c0_0 = arith.constant 0 : index
    %1 = vector.load %arg8[%c0, %c0_0] : memref<8x290xbf16, #tpu.memory_space<vmem>>, vector<8x1xbf16>
    tpu.vector_store %arg8[%c0, %c0_0], %0 {strides = array<i32>} : memref<8x290xbf16, #tpu.memory_space<vmem>>, vector<8x1xbf16>,
    %c0_1 = arith.constant 0 : index
    %c289 = arith.constant 289 : index
    %2 = vector.load %arg8[%c0_1, %c289] : memref<8x290xbf16, #tpu.memory_space<vmem>>, vector<8x1xbf16>
    tpu.vector_store %arg8[%c0_1, %c289], %0 {strides = array<i32>} : memref<8x290xbf16, #tpu.memory_space<vmem>>, vector<8x1xbf16>,
    %c0_2 = arith.constant 0 : index
    %c0_3 = arith.constant 0 : index
    %c0_4 = arith.constant 0 : index
    %c0_5 = arith.constant 0 : index
    %3 = vector.load %arg3[%c0_2, %c0_3, %c0_4, %c0_5] : memref<1x1x8x32xbf16, #tpu.memory_space<vmem>>, vector<1x1x8x32xbf16>
    %4 = vector.shape_cast %3 : vector<1x1x8x32xbf16> to vector<8x32xbf16>
    %5 = vector.extract_strided_slice %4 {offsets = [0, 0], sizes = [8, 16], strides = [1, 1]} : vector<8x32xbf16> to vector<8x16xbf16>
    %c0_6 = arith.constant 0 : index
    %c1 = arith.constant 1 : index
    %6 = vector.load %arg8[%c0_6, %c1] : memref<8x290xbf16, #tpu.memory_space<vmem>>, vector<8x16xbf16>
    tpu.vector_store %arg8[%c0_6, %c1], %5 {strides = array<i32>} : memref<8x290xbf16, #tpu.memory_space<vmem>>, vector<8x16xbf16>,
    %7 = vector.extract_strided_slice %4 {offsets = [0, 16], sizes = [8, 16], strides = [1, 1]} : vector<8x32xbf16> to vector<8x16xbf16>
    %c0_7 = arith.constant 0 : index
    %c273 = arith.constant 273 : index
    %8 = vector.load %arg8[%c0_7, %c273] : memref<8x290xbf16, #tpu.memory_space<vmem>>, vector<8x16xbf16>
    tpu.vector_store %arg8[%c0_7, %c273], %7 {strides = array<i32>} : memref<8x290xbf16, #tpu.memory_space<vmem>>, vector<8x16xbf16>,
    %c0_8 = arith.constant 0 : index
    %c0_9 = arith.constant 0 : index
    %c0_10 = arith.constant 0 : index
    %9 = vector.load %arg2[%c0_8, %c0_9, %c0_10] : memref<1x8x256xbf16, #tpu.memory_space<vmem>>, vector<1x8x256xbf16>
    %10 = vector.shape_cast %9 : vector<1x8x256xbf16> to vector<8x256xbf16>
    %c0_11 = arith.constant 0 : index
    %c17 = arith.constant 17 : index
    %11 = vector.load %arg8[%c0_11, %c17] : memref<8x290xbf16, #tpu.memory_space<vmem>>, vector<8x256xbf16>
    tpu.vector_store %arg8[%c0_11, %c17], %10 {strides = array<i32>} : memref<8x290xbf16, #tpu.memory_space<vmem>>, vector<8x256xbf16>,
    %12 = tpu.iota {dimensions = array<i32: 1>} : vector<1x256xi32>
    %c16_i32 = arith.constant 16 : i32
    %c0_i32 = arith.constant 0 : i32
    %13 = arith.cmpi eq, %c16_i32, %c0_i32 : i32
    %c1_i32 = arith.constant 1 : i32
    %14 = arith.select %13, %c1_i32, %c16_i32 : i32
    %15 = vector.broadcast %14 : i32 to vector<1x256xi32>
    %16 = arith.remsi %12, %15 : vector<1x256xi32>
    %c0_i32_12 = arith.constant 0 : i32
    %17 = vector.broadcast %c0_i32_12 : i32 to vector<1x256xi32>
    %18 = arith.cmpi ne, %16, %17 : vector<1x256xi32>
    %c0_i32_13 = arith.constant 0 : i32
    %19 = vector.broadcast %c0_i32_13 : i32 to vector<1x256xi32>
    %20 = arith.cmpi slt, %16, %19 : vector<1x256xi32>
    %c0_i32_14 = arith.constant 0 : i32
    %21 = arith.cmpi slt, %14, %c0_i32_14 : i32
    %22 = vector.broadcast %21 : i1 to vector<1x256xi1>
    %23 = vector.broadcast %22 : vector<1x256xi1> to vector<1x256xi1>
    %24 = arith.xori %20, %23 : vector<1x256xi1>
    %25 = arith.andi %24, %18 : vector<1x256xi1>
    %26 = vector.broadcast %14 : i32 to vector<1x256xi32>
    %27 = arith.addi %16, %26 : vector<1x256xi32>
    %28 = arith.select %25, %27, %16 : vector<1x256xi1>, vector<1x256xi32>
    %c1_i32_15 = arith.constant 1 : i32
    %29 = vector.broadcast %c1_i32_15 : i32 to vector<1x256xi32>
    %30 = arith.cmpi sge, %28, %29 : vector<1x256xi32>
    %c15_i32 = arith.constant 15 : i32
    %31 = vector.broadcast %c15_i32 : i32 to vector<1x256xi32>
    %32 = arith.cmpi slt, %28, %31 : vector<1x256xi32>
    %c0_16 = arith.constant 0 : index
    %c0_17 = arith.constant 0 : index
    %33 = vector.load %arg8[%c0_16, %c0_17] : memref<8x290xbf16, #tpu.memory_space<vmem>>, vector<8x256xbf16>
    %cst_18 = arith.constant 0.000000e+00 : bf16
    %34 = vector.shape_cast %30 : vector<1x256xi1> to vector<1x256xi1>
    %35 = vector.broadcast %34 : vector<1x256xi1> to vector<8x256xi1>
    %36 = vector.broadcast %cst_18 : bf16 to vector<8x256xbf16>
    %37 = arith.select %35, %33, %36 : vector<8x256xi1>, vector<8x256xbf16>
    %c0_19 = arith.constant 0 : index
    %c0_20 = arith.constant 0 : index
    %38 = vector.load %arg9[%c0_19, %c0_20] : memref<72x256xbf16, #tpu.memory_space<vmem>>, vector<8x256xbf16>
    tpu.vector_store %arg9[%c0_19, %c0_20], %37 {strides = array<i32>} : memref<72x256xbf16, #tpu.memory_space<vmem>>, vector<8x256xbf16>,
    %c0_21 = arith.constant 0 : index
    %c1_22 = arith.constant 1 : index
    %39 = vector.load %arg8[%c0_21, %c1_22] : memref<8x290xbf16, #tpu.memory_space<vmem>>, vector<8x256xbf16>
    %c8 = arith.constant 8 : index
    %c0_23 = arith.constant 0 : index
    %40 = vector.load %arg9[%c8, %c0_23] : memref<72x256xbf16, #tpu.memory_space<vmem>>, vector<8x256xbf16>
    tpu.vector_store %arg9[%c8, %c0_23], %39 {strides = array<i32>} : memref<72x256xbf16, #tpu.memory_space<vmem>>, vector<8x256xbf16>,
    %c0_24 = arith.constant 0 : index
    %c2 = arith.constant 2 : index
    %41 = vector.load %arg8[%c0_24, %c2] : memref<8x290xbf16, #tpu.memory_space<vmem>>, vector<8x256xbf16>
    %cst_25 = arith.constant 0.000000e+00 : bf16
    %42 = vector.shape_cast %32 : vector<1x256xi1> to vector<1x256xi1>
    %43 = vector.broadcast %42 : vector<1x256xi1> to vector<8x256xi1>
    %44 = vector.broadcast %cst_25 : bf16 to vector<8x256xbf16>
    %45 = arith.select %43, %41, %44 : vector<8x256xi1>, vector<8x256xbf16>
    %c16 = arith.constant 16 : index
    %c0_26 = arith.constant 0 : index
    %46 = vector.load %arg9[%c16, %c0_26] : memref<72x256xbf16, #tpu.memory_space<vmem>>, vector<8x256xbf16>
    tpu.vector_store %arg9[%c16, %c0_26], %45 {strides = array<i32>} : memref<72x256xbf16, #tpu.memory_space<vmem>>, vector<8x256xbf16>,
    %c0_27 = arith.constant 0 : index
    %c16_28 = arith.constant 16 : index
    %47 = vector.load %arg8[%c0_27, %c16_28] : memref<8x290xbf16, #tpu.memory_space<vmem>>, vector<8x256xbf16>
    %cst_29 = arith.constant 0.000000e+00 : bf16
    %48 = vector.shape_cast %30 : vector<1x256xi1> to vector<1x256xi1>
    %49 = vector.broadcast %48 : vector<1x256xi1> to vector<8x256xi1>
    %50 = vector.broadcast %cst_29 : bf16 to vector<8x256xbf16>
    %51 = arith.select %49, %47, %50 : vector<8x256xi1>, vector<8x256xbf16>
    %c24 = arith.constant 24 : index
    %c0_30 = arith.constant 0 : index
    %52 = vector.load %arg9[%c24, %c0_30] : memref<72x256xbf16, #tpu.memory_space<vmem>>, vector<8x256xbf16>
    tpu.vector_store %arg9[%c24, %c0_30], %51 {strides = array<i32>} : memref<72x256xbf16, #tpu.memory_space<vmem>>, vector<8x256xbf16>,
    %c0_31 = arith.constant 0 : index
    %c17_32 = arith.constant 17 : index
    %53 = vector.load %arg8[%c0_31, %c17_32] : memref<8x290xbf16, #tpu.memory_space<vmem>>, vector<8x256xbf16>
    %c32 = arith.constant 32 : index
    %c0_33 = arith.constant 0 : index
    %54 = vector.load %arg9[%c32, %c0_33] : memref<72x256xbf16, #tpu.memory_space<vmem>>, vector<8x256xbf16>
    tpu.vector_store %arg9[%c32, %c0_33], %53 {strides = array<i32>} : memref<72x256xbf16, #tpu.memory_space<vmem>>, vector<8x256xbf16>,
    %c0_34 = arith.constant 0 : index
    %c18 = arith.constant 18 : index
    %55 = vector.load %arg8[%c0_34, %c18] : memref<8x290xbf16, #tpu.memory_space<vmem>>, vector<8x256xbf16>
    %cst_35 = arith.constant 0.000000e+00 : bf16
    %56 = vector.shape_cast %32 : vector<1x256xi1> to vector<1x256xi1>
    %57 = vector.broadcast %56 : vector<1x256xi1> to vector<8x256xi1>
    %58 = vector.broadcast %cst_35 : bf16 to vector<8x256xbf16>
    %59 = arith.select %57, %55, %58 : vector<8x256xi1>, vector<8x256xbf16>
    %c40 = arith.constant 40 : index
    %c0_36 = arith.constant 0 : index
    %60 = vector.load %arg9[%c40, %c0_36] : memref<72x256xbf16, #tpu.memory_space<vmem>>, vector<8x256xbf16>
    tpu.vector_store %arg9[%c40, %c0_36], %59 {strides = array<i32>} : memref<72x256xbf16, #tpu.memory_space<vmem>>, vector<8x256xbf16>,
    %c0_37 = arith.constant 0 : index
    %c32_38 = arith.constant 32 : index
    %61 = vector.load %arg8[%c0_37, %c32_38] : memref<8x290xbf16, #tpu.memory_space<vmem>>, vector<8x256xbf16>
    %cst_39 = arith.constant 0.000000e+00 : bf16
    %62 = vector.shape_cast %30 : vector<1x256xi1> to vector<1x256xi1>
    %63 = vector.broadcast %62 : vector<1x256xi1> to vector<8x256xi1>
    %64 = vector.broadcast %cst_39 : bf16 to vector<8x256xbf16>
    %65 = arith.select %63, %61, %64 : vector<8x256xi1>, vector<8x256xbf16>
    %c48 = arith.constant 48 : index
    %c0_40 = arith.constant 0 : index
    %66 = vector.load %arg9[%c48, %c0_40] : memref<72x256xbf16, #tpu.memory_space<vmem>>, vector<8x256xbf16>
    tpu.vector_store %arg9[%c48, %c0_40], %65 {strides = array<i32>} : memref<72x256xbf16, #tpu.memory_space<vmem>>, vector<8x256xbf16>,
    %c0_41 = arith.constant 0 : index
    %c33 = arith.constant 33 : index
    %67 = vector.load %arg8[%c0_41, %c33] : memref<8x290xbf16, #tpu.memory_space<vmem>>, vector<8x256xbf16>
    %c56 = arith.constant 56 : index
    %c0_42 = arith.constant 0 : index
    %68 = vector.load %arg9[%c56, %c0_42] : memref<72x256xbf16, #tpu.memory_space<vmem>>, vector<8x256xbf16>
    tpu.vector_store %arg9[%c56, %c0_42], %67 {strides = array<i32>} : memref<72x256xbf16, #tpu.memory_space<vmem>>, vector<8x256xbf16>,
    %c0_43 = arith.constant 0 : index
    %c34 = arith.constant 34 : index
    %69 = vector.load %arg8[%c0_43, %c34] : memref<8x290xbf16, #tpu.memory_space<vmem>>, vector<8x256xbf16>
    %cst_44 = arith.constant 0.000000e+00 : bf16
    %70 = vector.shape_cast %32 : vector<1x256xi1> to vector<1x256xi1>
    %71 = vector.broadcast %70 : vector<1x256xi1> to vector<8x256xi1>
    %72 = vector.broadcast %cst_44 : bf16 to vector<8x256xbf16>
    %73 = arith.select %71, %69, %72 : vector<8x256xi1>, vector<8x256xbf16>
    %c64 = arith.constant 64 : index
    %c0_45 = arith.constant 0 : index
    %74 = vector.load %arg9[%c64, %c0_45] : memref<72x256xbf16, #tpu.memory_space<vmem>>, vector<8x256xbf16>
    tpu.vector_store %arg9[%c64, %c0_45], %73 {strides = array<i32>} : memref<72x256xbf16, #tpu.memory_space<vmem>>, vector<8x256xbf16>,
    %c0_46 = arith.constant 0 : index
    %c0_47 = arith.constant 0 : index
    %c0_48 = arith.constant 0 : index
    %75 = vector.load %arg4[%c0_46, %c0_47, %c0_48] : memref<1x16x72xbf16, #tpu.memory_space<vmem>>, vector<1x16x72xbf16>
    %76 = vector.shape_cast %75 : vector<1x16x72xbf16> to vector<16x72xbf16>
    %c0_49 = arith.constant 0 : index
    %c0_50 = arith.constant 0 : index
    %77 = vector.load %arg9[%c0_49, %c0_50] : memref<72x256xbf16, #tpu.memory_space<vmem>>, vector<72x256xbf16>
    %cst_51 = arith.constant dense<0.000000e+00> : vector<16x256xf32>
    %78 = tpu.matmul %76, %77, %cst_51 {dimension_numbers = #tpu.dot_dimension_numbers<[1], [0], [0], [1], [0, 0, 1, 1], [], []>} : vector<16x72xbf16>, vector<72x256xbf16>, vector<16x256xf32> -> vector<16x256xf32>
    %c0_52 = arith.constant 0 : index
    %c0_53 = arith.constant 0 : index
    %79 = vector.load %arg10[%c0_52, %c0_53] : memref<16x256xf32, #tpu.memory_space<vmem>>, vector<16x256xf32>
    tpu.vector_store %arg10[%c0_52, %c0_53], %78 {strides = array<i32>} : memref<16x256xf32, #tpu.memory_space<vmem>>, vector<16x256xf32>,
    %c0_54 = arith.constant 0 : index
    %c0_55 = arith.constant 0 : index
    %80 = vector.load %arg10[%c0_54, %c0_55] : memref<16x256xf32, #tpu.memory_space<vmem>>, vector<16x256xf32>
    %c0_56 = arith.constant 0 : index
    %c0_57 = arith.constant 0 : index
    %81 = vector.load %arg5[%c0_56, %c0_57] : memref<16x1xf32, #tpu.memory_space<vmem>>, vector<16x1xf32>
    %82 = vector.broadcast %81 : vector<16x1xf32> to vector<16x256xf32>
    %83 = arith.mulf %80, %82 : vector<16x256xf32>
    %c0_58 = arith.constant 0 : index
    %c0_59 = arith.constant 0 : index
    %84 = vector.load %arg6[%c0_58, %c0_59] : memref<16x1xf32, #tpu.memory_space<vmem>>, vector<16x1xf32>
    %85 = vector.broadcast %84 : vector<16x1xf32> to vector<16x256xf32>
    %86 = arith.addf %83, %85 : vector<16x256xf32>
    %cst_60 = arith.constant 0.000000e+00 : f32
    %87 = vector.broadcast %cst_60 : f32 to vector<16x256xf32>
    %88 = arith.maximumf %86, %87 : vector<16x256xf32>
    %c0_61 = arith.constant 0 : index
    %c0_62 = arith.constant 0 : index
    %c0_63 = arith.constant 0 : index
    %89 = vector.load %arg7[%c0_61, %c0_62, %c0_63] : memref<1x16x256xf32, #tpu.memory_space<vmem>>, vector<1x16x256xf32>
    %90 = vector.shape_cast %89 : vector<1x16x256xf32> to vector<16x256xf32>
    %91 = vector.shape_cast %88 : vector<16x256xf32> to vector<1x16x256xf32>
    tpu.vector_store %arg7[%c0_61, %c0_62, %c0_63], %91 {strides = array<i32>} : memref<1x16x256xf32, #tpu.memory_space<vmem>>, vector<1x16x256xf32>,
    return
  }
  func.func @transform_0(%arg0: i32, %arg1: i32) -> (i32, i32, i32) {
    %c0_i32 = arith.constant 0 : i32
    %c0_i32_0 = arith.constant 0 : i32
    return %arg0, %c0_i32, %arg1 : i32, i32, i32
  }
  func.func @transform_1(%arg0: i32, %arg1: i32) -> (i32, i32, i32, i32) {
    %c0_i32 = arith.constant 0 : i32
    %c0_i32_0 = arith.constant 0 : i32
    %c0_i32_1 = arith.constant 0 : i32
    return %arg0, %arg1, %c0_i32, %c0_i32_0 : i32, i32, i32, i32
  }
  func.func @transform_2(%arg0: i32, %arg1: i32) -> (i32, i32, i32) {
    %c0_i32 = arith.constant 0 : i32
    %c0_i32_0 = arith.constant 0 : i32
    %c0_i32_1 = arith.constant 0 : i32
    %c0_i32_2 = arith.constant 0 : i32
    return %c0_i32, %c0_i32_0, %c0_i32_1 : i32, i32, i32
  }
  func.func @transform_3(%arg0: i32, %arg1: i32) -> (i32, i32) {
    %c0_i32 = arith.constant 0 : i32
    %c0_i32_0 = arith.constant 0 : i32
    %c0_i32_1 = arith.constant 0 : i32
    return %c0_i32, %c0_i32_0 : i32, i32
  }
  func.func @transform_4(%arg0: i32, %arg1: i32) -> (i32, i32) {
    %c0_i32 = arith.constant 0 : i32
    %c0_i32_0 = arith.constant 0 : i32
    %c0_i32_1 = arith.constant 0 : i32
    return %c0_i32, %c0_i32_0 : i32, i32
  }
  func.func @transform_5(%arg0: i32, %arg1: i32) -> (i32, i32, i32) {
    %c0_i32 = arith.constant 0 : i32
    %c0_i32_0 = arith.constant 0 : i32
    return %arg0, %c0_i32, %arg1 : i32, i32, i32
  }
}

</mosaic_0001>

<bundles_post_ra>
// kernel: tpu_custom_call.1
= control target key start
LH: loop header
LB: loop body
LE: loop exit
PB: predicated region body
PF: predicated region fallthrough
CT: control target
= control target key end

     0   :  { %10 = vsyncpa [#allocation6], 0  ;;  %s1354_s0 = inlined_call_operand.vmem [shape: bf16[2,8,256], index: 0, kind: input, shape index: {}]   ;;  %s1355_s1 = inlined_call_operand.vmem [shape: bf16[2,1,8,32], index: 1, kind: input, shape index: {}]   ;;  %s1356_s2 = inlined_call_operand.vmem [shape: bf16[1,16,72], index: 2, kind: input, shape index: {}]   ;;  %s1357_s3 = inlined_call_operand.vmem [shape: f32[16,1], index: 3, kind: input, shape index: {}]   ;;  %s1358_s4 = inlined_call_operand.vmem [shape: f32[16,1], index: 4, kind: input, shape index: {}]   ;;  %s1359_s5 = inlined_call_operand.hbm [shape: f32[2,16,256], index: 5, kind: output, shape index: {}]  }
   0x1   :  { %12 = vsyncpa [#allocation6 + $0x1], 0  ;;  %s1110_s18 = smov 0   ;;  %s1112_s19 = smov 0  }
   0x2   :  { %s1114_s20 = smov 0   ;;  %s1116_s21 = smov 0  }
   0x3   :  { %s1118_s22 = smov 0   ;;  %s1120_s23 = smov 0  }
   0x4 LB: > { %s845_s24 = sadd.s32 4294967295, %s1061_s23   ;;  %s846_s25 = sadd.s32 4294967294, %s1061_s23   ;;  %s1061_s23 = sphi %s1120_s23, %s18_s23   ;;  %s1057_s22 = sphi %s1118_s22, %s1384_s22   ;;  %s1053_s21 = sphi %s1116_s21, %s1383_s21   ;;  %s1049_s20 = sphi %s1114_s20, %s1382_s20   ;;  %s1045_s19 = sphi %s1112_s19, %s1381_s19   ;;  %s1041_s18 = sphi %s1110_s18, %s1380_s18  }
   0x5   : > { %s30_s26 = sadd.s32 1, %s1057_s22  ;;  %s158_s27 = sadd.s32 1, %s1049_s20 }
   0x6   : > { %p32_p0 = scmp.ge.s32.totalorder %s30_s26, 2  ;;  %p168_p1 = scmp.ne.s32.totalorder %s1049_s20, %s1045_s19 }
   0x7   : > { %p169_p2 = scmp.eq.s32.totalorder %s845_s24, 1  ;;  %p174_p3 = scmp.ne.s32.totalorder %s1045_s19, %s1041_s18 }
   0x8   : > { %s1386_s26 = smov (%p32_p0, %s30_s26), 0  ;;  %p175_p5 = scmp.eq.s32.totalorder %s846_s25, 1 }
   0x9   : > { %p1150_p4 = por %p169_p2, %p168_p1  ;;  %s153_s29 = ssub.s32 %s1057_s22, %s1386_s26 }
   0xa   : > { %p849_p6 = scmp.ge.s32.totalorder %s1061_s23, 1  ;;  %p156_p7 = scmp.eq.s32.totalorder %s153_s29, 0 }
   0xb   : > { %p1157_p8 = por %p175_p5, %p174_p3  ;;  %p225_p9 = scmp.lt.s32.totalorder %s1061_s23, 3 }
   0xc   : > { %s1163_s6 = scalar_select %p156_p7, %s1049_s20, %s158_s27  }
   0xd   : > { %p226_p10 = pnand %p849_p6, %p225_p9 }
   0xe   : > { %p265_p11 = scmp.lt.s32.totalorder (!%p226_p10), %s1053_s21, 1  ;;  %s1064_s13 = smov (!%p226_p10), 17  }
   0xf   : > { %229 = sbr.rel (%p226_p10) target bundleno = 479 (0x1df), region = 40  ;;  %s1065_s17 = smov (!%p226_p10), 34  }
  0x10   : > { %s1066_s24 = smov (!%p226_p10), 18   ;;  %s1067_s25 = smov (!%p226_p10), 1  }
  0x11   : > { %s1068_s27 = smov (!%p226_p10), 32   ;;  %s1069_s29 = smov (!%p226_p10), 2  }
  0x12   : > { %s1072_s9 = smov (!%p226_p10), 111   ;;  %s1073_s10 = smov (!%p226_p10), 96  }
  0x13   : > { %s1077_s14 = smov (!%p226_p10), 127   ;;  %s1078_s15 = smov (!%p226_p10), 112  }
  0x14   : > { %v313_v0 = vlaneseq  ;;  %v1063_v1 = vmov 0   ;;  %s266_s7 = scalar_select %p265_p11, %s1053_s21, 1  ;;  %vm285_vm6 = vcmask 3072   ;;  %vm287_vm7 = vcmask 273672  }
  0x15   : > { %982 = vset.pattern.permute.xlu1 %v1063_v1  ;;  %981 = vset.pattern.permute.xlu0 %v1063_v1  ;;  %286 = vst.msk [vmem:[#allocation2] sm:$0xf] %vm285_vm6, %v1063_v1  ;;  %vm307_vm8 = vcmask 1043592   ;;  %vm308_vm9 = vcmask 1047556   ;;  %vm294_vm10 = vcmask 134152   ;;  %vm303_vm11 = vcmask 138240  }
  0x16   : > { %v314_v2 = vand.u32 127, %v313_v0  ;;  %980 = vset.pattern.permute.xlu2 %v1063_v1  ;;  %s897_s8 = sshll.u32 %s266_s7, 3  ;;  %s853_s12 = sshll.u32 %s266_s7, 2  ;;  %288 = vst.msk [vmem:[#allocation2 + $0x8] sm:$0xf] %vm287_vm7, %v1063_v1  ;;  %vm296_vm12 = vcmask 265352   ;;  %vm309_vm13 = vmor %vm308_vm9, %vm307_vm8  ;;  %v1193_v22 = vunpack.c.l.b16 %v1063_v1  ;;  %v1195_v23 = vunpack.c.h.b16 %v1063_v1 }
  0x17   : > { %s272_s11 = scalar_lea.vmem %s1354_s0, %s897_s8  ;;  %s280_s16 = scalar_lea.vmem %s1355_s1, %s853_s12  ;;  %vm311_vm14 = vcmask 134144   ;;  %vm554_vm8 = vcmask 277504  }
  0x18   : > { %v315_v3 = vadd.s32 128, %v314_v2  ;;  %v320_v4 = vand.u32 15, %v314_v2  ;;  %v298_v5 = vld [vmem:[%s272_s11] sm:$0xff]  ;;  %s1070_s7 = smov 16   ;;  %s1071_s8 = smov 95  }
  0x19   : > { %300 = vrot.lane.b32.xlu0 %v298_v5, %s1064_s13  ;;  %v289_v10 = vld [vmem:[%s280_s16] sm:$0xf]  ;;  %s1074_s11 = smov 94   ;;  %s1075_s12 = smov 126  }
  0x1a   : > { %v327_v6 = vand.u32 15, %v315_v3  ;;  %vm342_vm0 = vcmp.lt.s32.totalorder %v320_v4, 15  ;;  %vm1173_vm3 = vcmp.ge.s32.totalorder %v320_v4, 1  ;;  %s1076_s13 = smov 110  }
  0x1c   : > { %vm343_vm1 = vcmp.lt.s32.totalorder %v327_v6, 15  ;;  %vm1177_vm4 = vcmp.ge.s32.totalorder %v327_v6, 1 }
  0x1d   : > { %vm374_vm2 = vmpackc.low %vm343_vm1, %vm342_vm0  ;;  %vm503_vm1 = vcmask 261120  }
  0x1e   : > { %v375_v7 = vsel %vm374_vm2, 65537, %v1063_v1  ;;  %vm349_vm5 = vmpackc.low %vm1177_vm4, %vm1173_vm3 }
  0x1f   : > { %551 = vrot.lane.b32.xlu1 %v375_v7, %s1065_s17  ;;  %464 = vrot.lane.b32.xlu2 %v375_v7, %s1066_s24  ;;  %v412_v11 = vsel %vm349_vm5, 65537, %v1063_v1 }
  0x21   : > { %291 = vrot.lane.b32.xlu0 %v289_v10, %s1067_s25 }
  0x27   : > { %500 = vrot.lane.b32.xlu1 %v412_v11, %s1068_s27  ;;  %376 = vrot.lane.b32.xlu2 %v375_v7, %s1069_s29 }
  0x29   : > { %413 = vrot.lane.b32.xlu0 %v412_v11, %s1070_s7 }
  0x79   : > { %v1191_v13 = vpop.permute.xlu2 %464 }
  0x7a   : > { %v466_v43 = vrot.slane %v1191_v13, 4 }
  0x7c   : > { %v476_v58 = vunpack.c.l.b16 %v466_v43  ;;  %v477_v59 = vunpack.c.h.b16 %v466_v43 }
  0x81   : > { %v377_v18 = vpop.permute.xlu2 %376 }
  0x82   : > { %v378_v20 = vrot.slane %v377_v18, 4 }
  0x84   : > { %v388_v28 = vunpack.c.l.b16 %v378_v20  ;;  %v389_v29 = vunpack.c.h.b16 %v378_v20 }
  0x86   : > { %vm1211_vm6 = vcmp.ne.s32.totalorder %v388_v28, %v1193_v22  ;;  %vm1216_vm7 = vcmp.ne.s32.totalorder %v389_v29, %v1195_v23 }
  0x8b   : > { %v301_v12 = vpop.permute.xlu0 %300 }
  0x8c   : > { %v302_v15 = vrot.slane %v301_v12, 4 }
  0x8e   : > { %v304_v17 = vsel %vm303_vm11, %v302_v15, %v301_v12  ;;  %vm394_vm11 = vmpackc.low %vm1216_vm7, %vm1211_vm6 }
  0x91   : > { %v552_v14 = vpop.permute.xlu1 %551 }
  0x92   : > { %v553_v24 = vrot.slane %v552_v14, 4 }
  0x93   : > { %v292_v16 = vpop.permute.xlu0 %291 }
  0x94   : > { %295 = vst.msk [vmem:[#allocation2] sm:$0xf] %vm294_vm10, %v292_v16  ;;  %v563_v33 = vunpack.c.l.b16 %v553_v24  ;;  %v564_v34 = vunpack.c.h.b16 %v553_v24  ;;  %v555_v44 = vsel %vm554_vm8, %v553_v24, %v552_v14 }
  0x95   : > { %297 = vst.msk [vmem:[#allocation2 + $0x8] sm:$0xf] %vm296_vm12, %v292_v16  ;;  %vm467_vm12 = vcmask 146432   ;;  %v556_v49 = vunpack.c.l.b16 %v555_v44  ;;  %v557_v50 = vunpack.c.h.b16 %v555_v44 }
  0x96   : > { %310 = vst.msk [vmem:[#allocation2] sm:$0xff] %vm309_vm13, %v304_v17  ;;  %vm567_vm9 = vcmp.ne.s32.totalorder %v563_v33, %v1193_v22  ;;  %vm568_vm10 = vcmp.ne.s32.totalorder %v564_v34, %v1195_v23  ;;  %v468_v51 = vsel %vm467_vm12, %v466_v43, %v1191_v13 }
  0x97   : > { %312 = vst.msk [vmem:[#allocation2 + $0x8] sm:$0xf] %vm311_vm14, %v302_v15  ;;  %vm569_vm13 = vmpackc.low %vm568_vm10, %vm567_vm9  ;;  %vm379_vm14 = vcmask 15360   ;;  %v469_v53 = vunpack.c.l.b16 %v468_v51  ;;  %v470_v54 = vunpack.c.h.b16 %v468_v51  ;;  %vm1260_vm10 = vcmp.ne.s32.totalorder %v476_v58, %v1193_v22  ;;  %v694_v58 = vld [vmem:[%s1357_s3 + $0x8] sm:$0xff] }
  0x98   : > { %v380_v52 = vsel %vm379_vm14, %v378_v20, %v377_v18 }
  0x99   : > { %v501_v19 = vpop.permute.xlu1 %500  ;;  %v381_v56 = vunpack.c.l.b16 %v380_v52  ;;  %v382_v57 = vunpack.c.h.b16 %v380_v52  ;;  %vm1248_vm6 = vcmp.ne.s32.totalorder %v469_v53, %v1193_v22  ;;  %vm1253_vm7 = vcmp.ne.s32.totalorder %v470_v54, %v1195_v23 }
  0x9a   : > { %v502_v21 = vrot.slane %v501_v19, 4  ;;  %vm475_vm12 = vmpackc.low %vm1253_vm7, %vm1248_vm6  ;;  %vm545_vm6 = vcmask 777216   ;;  %vm406_vm7 = vcmask 1031168  }
  0x9b   : > { %v414_v55 = vpop.permute.xlu0 %413  ;;  %vm385_vm8 = vcmp.ne.s32.totalorder %v381_v56, %v1193_v22  ;;  %vm386_vm9 = vcmp.ne.s32.totalorder %v382_v57, %v1195_v23  ;;  %v709_v57 = vld [vmem:[%s1358_s4] sm:$0xff] }
  0x9c   : > { %v512_v25 = vunpack.c.l.b16 %v502_v21  ;;  %v513_v26 = vunpack.c.h.b16 %v502_v21  ;;  %v504_v39 = vsel %vm503_vm1, %v502_v21, %v501_v19  ;;  %v415_v60 = vrot.slane %v414_v55, 4 }
  0x9d   : > { %v1207_v36 = vld [vmem:[#allocation2] sm:$0xff]  ;;  %v505_v45 = vunpack.c.l.b16 %v504_v39  ;;  %v506_v46 = vunpack.c.h.b16 %v504_v39 }
  0x9e   : > { %vm1198_vm15 = vcmp.ne.s32.totalorder %v512_v25, %v1193_v22  ;;  %vm517_vm0 = vcmp.ne.s32.totalorder %v513_v26, %v1195_v23  ;;  %v535_v30 = vld [vmem:[#allocation2 + $0x8] sm:$0xf]  ;;  %v350_v40 = vsel %vm349_vm5, %v1207_v36, 0  ;;  %v425_v5 = vunpack.c.l.b16 %v415_v60 }
  0x9f   : > { %vm518_vm2 = vmpackc.low %vm517_vm0, %vm1198_vm15  ;;  %v448_v31 = vld [vmem:[#allocation2 + $0x8] sm:$0xf]  ;;  %540 = vrot.lane.b32.xlu0 %v535_v30, %s1071_s8  ;;  %351 = vst [vmem:[#allocation3] sm:$0xff] %v350_v40  ;;  %vm509_vm3 = vcmp.ne.s32.totalorder %v505_v45, %v1193_v22  ;;  %vm510_vm4 = vcmp.ne.s32.totalorder %v506_v46, %v1195_v23  ;;  %vm560_vm15 = vcmp.ne.s32.totalorder %v556_v49, %v1193_v22  ;;  %v426_v6 = vunpack.c.h.b16 %v415_v60 }
  0xa0   : > { %v499_v32 = vld [vmem:[#allocation2 + $0x8] sm:$0xf]  ;;  %453 = vrot.lane.b32.xlu2 %v448_v31, %s1072_s9  ;;  %vm511_vm5 = vmpackc.low %vm510_vm4, %vm509_vm3  ;;  %vm561_vm0 = vcmp.ne.s32.totalorder %v557_v50, %v1195_v23  ;;  %v483_v9 = vsel %vm475_vm12, %v1207_v36, 0  ;;  %vm429_vm3 = vcmp.ne.s32.totalorder %v425_v5, %v1193_v22  ;;  %vm443_vm12 = vcmask 916480  }
  0xa1   : > { %v520_v35 = vsel %vm518_vm2, %v499_v32, 0  ;;  %v550_v41 = vld [vmem:[#allocation2 + $0x8] sm:$0xf]  ;;  %v519_v61 = vsel %vm511_vm5, %v1207_v36, 0  ;;  %vm562_vm1 = vmpackc.low %vm561_vm0, %vm560_vm15  ;;  %vm416_vm2 = vcmask 130048   ;;  %vm430_vm4 = vcmp.ne.s32.totalorder %v426_v6, %v1195_v23 }
  0xa2   : > { %525 = vrot.lane.b32.xlu1 %v520_v35, %s1073_s10  ;;  %v369_v42 = vld [vmem:[#allocation2 + $0x8] sm:$0xf]  ;;  %v571_v47 = vsel %vm569_vm13, %v550_v41, 0  ;;  %v570_v62 = vsel %vm562_vm1, %v1207_v36, 0  ;;  %v417_v3 = vsel %vm416_vm2, %v415_v60, %v414_v55  ;;  %vm387_vm13 = vmpackc.low %vm386_vm9, %vm385_vm8  ;;  %vm362_vm2 = vcmask 1043456  }
  0xa3   : > { %v396_v48 = vsel %vm394_vm11, %v369_v42, 0  ;;  %vm1265_vm11 = vcmp.ne.s32.totalorder %v477_v59, %v1195_v23  ;;  %v463_v4 = vld [vmem:[#allocation2 + $0x8] sm:$0xf]  ;;  %v418_v7 = vunpack.c.l.b16 %v417_v3  ;;  %v419_v8 = vunpack.c.h.b16 %v417_v3  ;;  %vm431_vm0 = vmpackc.low %vm430_vm4, %vm429_vm3  ;;  %v693_v59 = vld [vmem:[%s1357_s3] sm:$0xff] }
  0xa4   : > { %vm482_vm14 = vmpackc.low %vm1265_vm11, %vm1260_vm10  ;;  %v395_v10 = vsel %vm387_vm13, %v1207_v36, 0  ;;  %v411_v12 = vld [vmem:[#allocation2 + $0x8] sm:$0xf]  ;;  %vm458_vm8 = vcmask 908288   ;;  %vm530_vm9 = vcmask 785408   ;;  %vm581_vm10 = vcmask 769024  }
  0xa5   : > { %v484_v11 = vsel %vm482_vm14, %v463_v4, 0  ;;  %vm422_vm5 = vcmp.ne.s32.totalorder %v418_v7, %v1193_v22  ;;  %vm423_vm15 = vcmp.ne.s32.totalorder %v419_v8, %v1195_v23  ;;  %v433_v13 = vsel %vm431_vm0, %v411_v12, 0  ;;  %v353_v15 = vld [vmem:[#allocation2 + $0x8] sm:$0xf] }
  0xa6   : > { %vm424_vm1 = vmpackc.low %vm423_vm15, %vm422_vm5  ;;  %vm494_vm11 = vcmask 900096   ;;  %v710_v7 = vld [vmem:[%s1358_s4 + $0x8] sm:$0xff]  ;;  %vm364_vm13 = vcmask 1039360   ;;  %vm646_vm14 = vcmask 588800  }
  0xa7   : > { %401 = vrot.lane.b32.xlu0 %v396_v48, %s1075_s12  ;;  %v432_v14 = vsel %vm424_vm1, %v1207_v36, 0 }
  0xa8   : > { %576 = vrot.lane.b32.xlu2 %v571_v47, %s1074_s11 }
  0xaa   : > { %451 = vrot.lane.b32.xlu1 %v1207_v36, %s1072_s9 }
  0xaf   : > { %523 = vrot.lane.b32.xlu0 %v519_v61, %s1073_s10 }
  0xb0   : > { %538 = vrot.lane.b32.xlu2 %v1207_v36, %s1071_s8 }
  0xb2   : > { %574 = vrot.lane.b32.xlu1 %v570_v62, %s1074_s11  ;;  %s1003_s11 = scalar_lea.hbm %s1359_s5, 64 }
  0xb7   : > { %487 = vrot.lane.b32.xlu0 %v483_v9, %s1076_s13 }
  0xb8   : > { %399 = vrot.lane.b32.xlu2 %v395_v10, %s1075_s12  ;;  %s261_s12 = sand.u32 1, %s1045_s19  }
  0xba   : > { %489 = vrot.lane.b32.xlu1 %v484_v11, %s1076_s13  ;;  %s850_s13 = sshll.u32 %s261_s12, 5 }
  0xbf   : > { %356 = vrot.lane.b32.xlu0 %v1207_v36, %s1077_s14 }
  0xc0   : > { %438 = vrot.lane.b32.xlu2 %v433_v13, %s1078_s15 }
  0xc2   : > { %436 = vrot.lane.b32.xlu1 %v432_v14, %s1078_s15  ;;  %s263_s15 = scalar_lea.vmem [#allocation5], %s850_s13 }
  0xc3   : > { %s748_s25 = sshll.u32 %s263_s15, 4  ;;  %s749_s25 = int_to_ptr.vmem [resolvable:$true] %s748_s25 }
  0xc7   : > { %702 = vperm.xlu0 %981, %v694_v58  }
  0xc8   : > { %697 = vperm.xlu2 %980, %v693_v59  }
  0xca   : > { %358 = vrot.lane.b32.xlu1 %v353_v15, %s1077_s14  ;;  %s907_s14 = sshll.u32 %s1053_s21, 5  ;;  %s734_s21 = scalar_lea.sflag [#allocation6], %s261_s12 }
  0xcb   : > { %s747_s24 = scalar_lea.hbm %s1359_s5, %s907_s14 }
  0xcc   : > { %s750_s27 = sshll.u32 %s747_s24, 4  ;;  %s751_s27 = int_to_ptr.hbm [resolvable:$true] %s750_s27 }
  0xcd   : > { %s997_s29 = sshra.s32 %s751_s27, 4  ;;  %s998_s29 = int_to_ptr.hbm [resolvable:$true] %s997_s29 }
  0xce   : > { %s999_s8 = scalar_lea.hbm %s998_s29, 32  ;;  %p1004_p1 = scmp.lt.s32.totalorder %s998_s29, %s1359_s5 }
  0xcf   : > { %p1000_p12 = scmp.ne.s32.totalorder %s998_s29, %s999_s8  ;;  %p1005_p2 = scmp.lt.s32.totalorder %s1003_s11, %s999_s8 }
  0xd0   : > { %718 = vperm.xlu2 %980, %v710_v7  }
  0xd1   : > { %p1001_p13 = pnand %p1000_p12, %p1150_p4  ;;  %p1006_p3 = por %p1005_p2, %p1004_p1 }
  0xd2   : > { %713 = vperm.xlu1 %982, %v709_v57  }
  0xd3   : > { %p1002_p0 = pneg %p1001_p13 }
  0xd5   : > { %p1007_p5 = pnand %p1006_p3, %p1002_p0 }
  0xfa   : > { %v454_v16 = vpop.permute.xlu2 %453 }
  0xfb   : > { %v456_v30 = vrot.slane %v454_v16, 4 }
 0x102   : > { %v577_v17 = vpop.permute.xlu2 %576 }
 0x103   : > { %v579_v40 = vrot.slane %v577_v17, 4 }
 0x10a   : > { %v539_v18 = vpop.permute.xlu2 %538 }
 0x10b   : > { %v542_v20 = vrot.slane %v539_v18, 4 }
 0x111   : > { %v541_v19 = vpop.permute.xlu0 %540 }
 0x112   : > { %v543_v21 = vrot.slane %v541_v19, 4  ;;  %v400_v25 = vpop.permute.xlu2 %399 }
 0x113   : > { %v403_v27 = vrot.slane %v400_v25, 4 }
 0x114   : > { %v526_v22 = vpop.permute.xlu1 %525  ;;  %v544_v23 = vsel %vm362_vm2, %v542_v20, %v543_v21 }
 0x115   : > { %v546_v24 = vsel %vm545_vm6, %v539_v18, %v544_v23  ;;  %v528_v37 = vrot.slane %v526_v22, 4 }
 0x116   : > { %548 = vst [vmem:[#allocation3 + $0x38] sm:$0xff] %v546_v24 }
 0x119   : > { %v402_v26 = vpop.permute.xlu0 %401 }
 0x11a   : > { %v404_v28 = vrot.slane %v402_v26, 4  ;;  %v439_v3 = vpop.permute.xlu2 %438 }
 0x11b   : > { %v441_v5 = vrot.slane %v439_v3, 4 }
 0x11c   : > { %v452_v29 = vpop.permute.xlu1 %451  ;;  %v405_v32 = vsel %vm362_vm2, %v403_v27, %v404_v28  ;;  %v860_v28 = vld [vmem:[#allocation3] sm:$0xf] }
 0x11d   : > { %v455_v31 = vrot.slane %v452_v29, 4  ;;  %v407_v33 = vsel %vm406_vm7, %v400_v25, %v405_v32  ;;  %v906_v56 = vld [vmem:[#allocation3 + $0x34] sm:$0xf0]  ;;  %v886_v63 = vld [vmem:[#allocation3 + $0x38] sm:$0xf0] }
 0x11e   : > { %409 = vst [vmem:[#allocation3 + $0x10] sm:$0xff] %v407_v33 }
 0x11f   : > { %v457_v34 = vsel %vm362_vm2, %v455_v31, %v456_v30  ;;  %v899_v30 = vld [vmem:[#allocation3 + $0x4] sm:$0xf] }
 0x120   : > { %v459_v35 = vsel %vm458_vm8, %v452_v29, %v457_v34  ;;  %v898_v34 = vld [vmem:[%s1356_s2] sm:$0xff] }
 0x121   : > { %461 = vst [vmem:[#allocation3 + $0x20] sm:$0xff] %v459_v35  ;;  %v524_v36 = vpop.permute.xlu0 %523 }
 0x122   : > { %v527_v38 = vrot.slane %v524_v36, 4  ;;  %v698_v35 = vpop.permute.xlu2 %697 }
 0x124   : > { %v575_v39 = vpop.permute.xlu1 %574  ;;  %v529_v42 = vsel %vm362_vm2, %v527_v38, %v528_v37 }
 0x125   : > { %v578_v41 = vrot.slane %v575_v39, 4  ;;  %v531_v43 = vsel %vm530_vm9, %v524_v36, %v529_v42  ;;  %v868_v21 = vld [vmem:[#allocation3 + $0x10] sm:$0xf]  ;;  %v901_v24 = vld [vmem:[#allocation3 + $0x14] sm:$0xf] }
 0x126   : > { %533 = vst [vmem:[#allocation3 + $0x30] sm:$0xff] %v531_v43 }
 0x127   : > { %v580_v44 = vsel %vm362_vm2, %v578_v41, %v579_v40 }
 0x128   : > { %v582_v45 = vsel %vm581_vm10, %v575_v39, %v580_v44  ;;  %v876_v9 = vld [vmem:[#allocation3 + $0x20] sm:$0xf]  ;;  %v903_v12 = vld [vmem:[#allocation3 + $0x24] sm:$0xf] }
 0x129   : > { %v626_v46 = vunpack.c.l.b16 %v582_v45  ;;  %v627_v47 = vunpack.c.h.b16 %v582_v45  ;;  %v488_v48 = vpop.permute.xlu0 %487 }
 0x12a   : > { %v491_v52 = vrot.slane %v488_v48, 4 }
 0x12b   : > { %v636_v49 = vpack.c.b16 %v626_v46, %v626_v46  ;;  %v637_v50 = vpack.c.b16 %v627_v47, %v627_v47 }
 0x12c   : > { %v490_v51 = vpop.permute.xlu1 %489 }
 0x12d   : > { %v492_v53 = vrot.slane %v490_v51, 4  ;;  %v652_v54 = vsel %vm362_vm2, %v636_v49, 0  ;;  %v655_v55 = vsel %vm362_vm2, %v637_v50, 0  ;;  %v884_v61 = vld [vmem:[#allocation3 + $0x30] sm:$0xf]  ;;  %v719_v50 = vpop.permute.xlu2 %718 }
 0x12e   : > { %660 = vmatpush.bf16.msra.mxu0 %v652_v54  ;;  %674 = vmatpush.bf16.msra.mxu1 %v655_v55  ;;  %v905_v62 = vld [vmem:[#allocation3 + $0x34] sm:$0xf]  ;;  %v885_v1 = vor.u32 %v906_v56, %v884_v61 }
 0x12f   : > { %v493_v60 = vsel %vm362_vm2, %v491_v52, %v492_v53  ;;  %v889_v2 = vor.u32 %v905_v62, %v886_v63 }
 0x130   : > { %v495_v0 = vsel %vm494_vm11, %v488_v48, %v493_v60 }
 0x131   : > { %497 = vst [vmem:[#allocation3 + $0x28] sm:$0xff] %v495_v0  ;;  %v357_v16 = vpop.permute.xlu0 %356 }
 0x132   : > { %661 = vmatpush.bf16.msra.mxu0 %v885_v1  ;;  %675 = vmatpush.bf16.msra.mxu1 %v889_v2  ;;  %v360_v18 = vrot.slane %v357_v16, 4 }
 0x134   : > { %v437_v4 = vpop.permute.xlu1 %436 }
 0x135   : > { %v440_v6 = vrot.slane %v437_v4, 4 }
 0x137   : > { %v442_v8 = vsel %vm362_vm2, %v440_v6, %v441_v5 }
 0x138   : > { %v444_v10 = vsel %vm443_vm12, %v437_v4, %v442_v8  ;;  %v904_v11 = vld [vmem:[#allocation3 + $0x24] sm:$0xf0]  ;;  %v878_v13 = vld [vmem:[#allocation3 + $0x28] sm:$0xf0] }
 0x139   : > { %446 = vst [vmem:[#allocation3 + $0x18] sm:$0xff] %v444_v10  ;;  %v877_v14 = vor.u32 %v904_v11, %v876_v9  ;;  %v881_v15 = vor.u32 %v903_v12, %v878_v13  ;;  %v703_v45 = vpop.permute.xlu0 %702 }
 0x13b   : > { %662 = vmatpush.bf16.msra.mxu0 %v877_v14  ;;  %676 = vmatpush.bf16.msra.mxu1 %v881_v15 }
 0x13c   : > { %v359_v17 = vpop.permute.xlu1 %358 }
 0x13d   : > { %v361_v19 = vrot.slane %v359_v17, 4 }
 0x13f   : > { %v363_v20 = vsel %vm362_vm2, %v360_v18, %v361_v19 }
 0x140   : > { %v365_v22 = vsel %vm364_vm13, %v357_v16, %v363_v20  ;;  %v902_v23 = vld [vmem:[#allocation3 + $0x14] sm:$0xf0]  ;;  %v870_v25 = vld [vmem:[#allocation3 + $0x18] sm:$0xf0] }
 0x141   : > { %367 = vst [vmem:[#allocation3 + $0x8] sm:$0xff] %v365_v22  ;;  %v869_v26 = vor.u32 %v902_v23, %v868_v21  ;;  %v873_v27 = vor.u32 %v901_v24, %v870_v25 }
 0x143   : > { %663 = vmatpush.bf16.msra.mxu0 %v869_v26  ;;  %677 = vmatpush.bf16.msra.mxu1 %v873_v27 }
 0x144   : > { %v714_v36 = vpop.permute.xlu1 %713 }
 0x148   : > { %v900_v29 = vld [vmem:[#allocation3 + $0x4] sm:$0xf0]  ;;  %v862_v31 = vld [vmem:[#allocation3 + $0x8] sm:$0xf0] }
 0x149   : > { %v861_v32 = vor.u32 %v900_v29, %v860_v28  ;;  %v865_v33 = vor.u32 %v899_v30, %v862_v31 }
 0x14b   : > { %664 = vmatpush.bf16.msra.mxu0 %v861_v32  ;;  %678 = vmatpush.bf16.msra.mxu1 %v865_v33 }
 0x14e   : > { %890 = vmatmul.msk.bf16.vlgmr.msra.gmra.mxu0 %vm646_vm14, %v898_v34  ;;  %891 = vmatmul.msk.bf16.vlgmr.msra.gmra.mxu1 %vm646_vm14, %v898_v34 }
 0x1cb   : > { %v666_v37 = vpop.f32.mrf.mxu0  ;;  %v680_v38 = vpop.f32.mrf.mxu1 }
 0x1cc   : > { %v705_v39 = vmul.f32 %v698_v35, %v666_v37  ;;  %v706_v40 = vmul.f32 %v698_v35, %v680_v38 }
 0x1ce   : > { %v721_v41 = vadd.f32 %v714_v36, %v705_v39  ;;  %v722_v42 = vadd.f32 %v714_v36, %v706_v40 }
 0x1d0   : > { %v725_v43 = vmax.f32 %v721_v41, 0.0  ;;  %v726_v44 = vmax.f32 %v722_v42, 0.0 }
 0x1d2   : > { %729 = vst [vmem:[%s263_s15] sm:$0xff] %v725_v43 }
 0x1d3   : > { %730 = vst [vmem:[%s263_s15 + $0x8] sm:$0xff] %v726_v44  ;;  %v668_v46 = vpop.f32.mrf.mxu0  ;;  %v682_v47 = vpop.f32.mrf.mxu1 }
 0x1d4   : > { %v707_v48 = vmul.f32 %v703_v45, %v668_v46  ;;  %v708_v49 = vmul.f32 %v703_v45, %v682_v47 }
 0x1d6   : > { %v723_v51 = vadd.f32 %v719_v50, %v707_v48  ;;  %v724_v52 = vadd.f32 %v719_v50, %v708_v49 }
 0x1d8   : > { %v727_v53 = vmax.f32 %v723_v51, 0.0  ;;  %v728_v54 = vmax.f32 %v724_v52, 0.0 }
 0x1da   : > { %731 = vst [vmem:[%s263_s15 + $0x10] sm:$0xff] %v727_v53 }
 0x1db   : > { %732 = vst [vmem:[%s263_s15 + $0x18] sm:$0xff] %v728_v54 }
 0x1dc   : > { %1010 = shalt.err (!%p1007_p5)
}
 0x1dd   : > { %s1079_s12 = smov 256  }
 0x1de   : > { %908 = dma.vmem_to_hbm [thread:$0]  (%p1150_p4), %s749_s25, 512, %s751_s27, %s734_s21, %s1079_s12, %s1079_s12, %s1070_s7  }
 0x1df PF: > { %p914_p6 = scmp.ge.s32.totalorder %s1061_s23, 2  ;;  %s765_s15 = sand.u32 1, %s1041_s18  }
 0x1e0   : > { %s766_s16 = scalar_lea.sflag [#allocation6], %s765_s15 }
 0x1e1   : > { %p911_p7 = pnand %p914_p6, %p1157_p8 }
 0x1e3   : > { %p912_p9 = pneg %p911_p7 }
 0x1e5   : > { %1036 = dma.done.wait (%p912_p9), %s766_s16, 512  }
 0x1e6   : > { %1038 = vsyncadd (%p912_p9), %s766_s16, 4294966784  ;;  %s18_s23 = sadd.s32 1, %s1061_s23   ;;  %s1380_s18 = smov %s1045_s19 }
 0x1e7   : > { %p15_p10 = scmp.ge.s32.totalorder %s18_s23, 4   ;;  %s1381_s19 = smov %s1049_s20 }
 0x1e8   : > { %s1382_s20 = smov %s1163_s6  ;;  %s1383_s21 = smov %s1057_s22 }
 0x1e9   : > { %s1384_s22 = smov %s1386_s26  ;;  %17 = sbr.rel (!%p15_p10) target bundleno = 4 (0x4), region = 78 }
 0x1ee   :  { %772 = vsyncpa [#allocation6], 1 }
 0x1ef   :  { %774 = vsyncpa [#allocation6 + $0x1], 1 }

</bundles_post_ra>
